<compile_context>
chip_gen: v7x
topology: tpu7x:2x2x1
jax: 0.10.0
libtpu: 0.0.40
codegen_flags: <defaults>
</compile_context>

<pallas_src>
import jax
import jax.numpy as jnp
from jax.experimental import pallas as pl
from jax.experimental.pallas import tpu as pltpu

# Synthetic environment constants (Pendulum-v1-like).
NUM_STATES = 3      # env.observation_space.shape[0]
ACTION_DIM = 1      # env.action_space.shape[0]
MAX_ACTION = 2.0    # float(env.action_space.high[0])

H1 = 400
H2 = 300

# 128-lane padded hidden widths.
H1_PAD = 512
H2_PAD = 384        # keep 384 (3 x 128); do NOT pad to 512 (see header)

TB = 512            # batch tile for the gridded path (multiple of 256)
UNGRIDDED_MAX_B = 1024


def actor_kernel(x_ref, w1_ref, b1_ref, w2_ref, b2_ref, w3_ref, b3_ref, o_ref):
    x = x_ref[...]                                   # (B, NUM_STATES) f32

    # ---- fc1 (K = NUM_STATES): VPU broadcasts; an MXU pass would waste >97%
    #      of the systolic contraction for such a shallow K.
    h1 = b1_ref[...]                                 # (1, H1_PAD), broadcasts over batch
    for f in range(NUM_STATES):                      # static unroll (NUM_STATES is tiny)
        h1 = h1 + x[:, f:f + 1] * w1_ref[f:f + 1, :]
    h1 = jnp.maximum(h1, 0.0)                        # (B, H1_PAD) f32

    # ---- fc2: the only big matmul. bf16 operands on the MXU, f32 accumulate,
    #      f32 epilogue.
    h2 = jnp.dot(h1.astype(jnp.bfloat16), w2_ref[...],
                 preferred_element_type=jnp.float32)
    h2 = jnp.maximum(h2 + b2_ref[...], 0.0)          # (B, H2_PAD) f32

    # ---- fc3: for ACTION_DIM == 1 use a cross-lane reduce (XLU) instead of a
    #      1-lane MXU pop; otherwise a proper contraction.
    if ACTION_DIM == 1:
        h3 = jnp.sum(h2 * w3_ref[...], axis=-1, keepdims=True) + b3_ref[...]
    else:
        h3 = jax.lax.dot_general(h2, w3_ref[...],
                                 (((1,), (1,)), ((), ())),
                                 preferred_element_type=jnp.float32) + b3_ref[...]
    o_ref[...] = jnp.tanh(h3) * MAX_ACTION           # (B, ACTION_DIM) f32


def prepare_actor_params(w1, b1, w2, b2, w3, b3):
    """Pad feature dims to 128 multiples; cast the big fc2 weight to bf16.

    Weights follow (in_features, out_features) layout (transposed vs. torch),
    biases are (1, out_features).  Zero padding is numerically exact.
    """
    w1p = jnp.pad(w1.astype(jnp.float32), ((0, 0), (0, H1_PAD - H1)))
    b1p = jnp.pad(b1.astype(jnp.float32), ((0, 0), (0, H1_PAD - H1)))
    w2p = jnp.pad(w2.astype(jnp.float32),
                  ((0, H1_PAD - H1), (0, H2_PAD - H2))).astype(jnp.bfloat16)
    b2p = jnp.pad(b2.astype(jnp.float32), ((0, 0), (0, H2_PAD - H2)))
    # fc3 weight as a lane-dense (ACTION_DIM, H2_PAD) slab.
    w3p = jnp.pad(w3.astype(jnp.float32).reshape(H2, ACTION_DIM).T,
                  ((0, 0), (0, H2_PAD - H2)))
    b3p = b3.astype(jnp.float32).reshape(1, ACTION_DIM)
    return w1p, b1p, w2p, b2p, w3p, b3p


def _cost(batch_rows, args):
    flops = 2 * batch_rows * (NUM_STATES * H1_PAD + H1_PAD * H2_PAD
                              + H2_PAD * ACTION_DIM)
    bytes_accessed = sum(int(a.size) * a.dtype.itemsize for a in args)
    bytes_accessed += batch_rows * ACTION_DIM * 4    # output
    return pl.CostEstimate(flops=flops,
                           transcendentals=batch_rows * ACTION_DIM,
                           bytes_accessed=bytes_accessed)


def _actor_forward_small(state, w1p, b1p, w2p, b2p, w3p, b3p):
    """Single un-gridded call: everything lives in VMEM for one invocation."""
    B = state.shape[0]
    args = (state, w1p, b1p, w2p, b2p, w3p, b3p)
    vmem = pl.BlockSpec(memory_space=pltpu.MemorySpace.VMEM)
    return pl.pallas_call(
        actor_kernel,
        out_shape=jax.ShapeDtypeStruct((B, ACTION_DIM), jnp.float32),
        in_specs=[vmem] * 7,
        out_specs=vmem,
        cost_estimate=_cost(B, args),
    )(*args)


def _actor_forward_tiled(state, w1p, b1p, w2p, b2p, w3p, b3p):
    """Batch-gridded path: 512-row tiles, weights resident across iterations,
    parallel batch axis (both TCs on v7x), bounded VMEM at any batch size."""
    B = state.shape[0]
    n_tiles = pl.cdiv(B, TB)
    B_pad = n_tiles * TB
    if B_pad != B:
        state = jnp.pad(state, ((0, B_pad - B), (0, 0)))   # exact: zero rows sliced off below
    args = (state, w1p, b1p, w2p, b2p, w3p, b3p)

    out = pl.pallas_call(
        actor_kernel,
        out_shape=jax.ShapeDtypeStruct((B_pad, ACTION_DIM), jnp.float32),
        grid_spec=pltpu.PrefetchScalarGridSpec(
            num_scalar_prefetch=0,
            grid=(n_tiles,),
            in_specs=[
                pl.BlockSpec((TB, NUM_STATES), lambda i: (i, 0)),
                # Weights/biases: constant block index -> fetched once, resident.
                pl.BlockSpec((NUM_STATES, H1_PAD), lambda i: (0, 0)),
                pl.BlockSpec((1, H1_PAD), lambda i: (0, 0)),
                pl.BlockSpec((H1_PAD, H2_PAD), lambda i: (0, 0)),
                pl.BlockSpec((1, H2_PAD), lambda i: (0, 0)),
                pl.BlockSpec((ACTION_DIM, H2_PAD), lambda i: (0, 0)),
                pl.BlockSpec((1, ACTION_DIM), lambda i: (0, 0)),
            ],
            out_specs=pl.BlockSpec((TB, ACTION_DIM), lambda i: (i, 0)),
        ),
        compiler_params=pltpu.CompilerParams(
            dimension_semantics=("parallel",)),
        cost_estimate=_cost(B_pad, args),
    )(*args)
    return out[:B] if B_pad != B else out


@jax.jit
def actor_forward(state, w1p, b1p, w2p, b2p, w3p, b3p):
    # Shapes are static under jit, so this Python branch is resolved at trace time.
    if state.shape[0] <= UNGRIDDED_MAX_B:
        return _actor_forward_small(state, w1p, b1p, w2p, b2p, w3p, b3p)
    return _actor_forward_tiled(state, w1p, b1p, w2p, b2p, w3p, b3p)


def init_linear(key, fan_in, fan_out):
    """Deterministic init mimicking torch.nn.Linear default U[-1/sqrt(fan_in), 1/sqrt(fan_in)]."""
    kw, kb = jax.random.split(key)
    bound = 1.0 / jnp.sqrt(jnp.float32(fan_in))
    w = jax.random.uniform(kw, (fan_in, fan_out), jnp.float32, -bound, bound)
    b = jax.random.uniform(kb, (1, fan_out), jnp.float32, -bound, bound)
    return w, b


if __name__ == "__main__":
    key = jax.random.PRNGKey(0)
    k_small, k1, k2, k3, k_big = jax.random.split(key, 5)

    w1, b1 = init_linear(k1, NUM_STATES, H1)
    w2, b2 = init_linear(k2, H1, H2)
    w3, b3 = init_linear(k3, H2, ACTION_DIM)
    params = prepare_actor_params(w1, b1, w2, b2, w3, b3)

    def reference(s):
        # Pure-f32 reference of the original (unpadded, un-quantized) network.
        return jnp.tanh(
            jnp.maximum(jnp.maximum(s @ w1 + b1, 0.0) @ w2 + b2, 0.0) @ w3 + b3
        ) * MAX_ACTION

    # ---- Small batch: single un-gridded call.
    batch = 8
    state = jax.random.normal(k_small, (batch, NUM_STATES), jnp.float32)
    out = jax.block_until_ready(actor_forward(state, *params))
    assert out.shape == (batch, ACTION_DIM)
    # bf16 fc2 introduces ~1e-3-level error; |out| <= MAX_ACTION = 2, so 2e-2 is tight.
    assert jnp.allclose(out, reference(state), atol=2e-2, rtol=2e-2)

    # ---- Large, non-tile-multiple batch: exercises the batch-gridded path
    #      (resident weights, parallel batch axis, wrapper-side pad + slice).
    big_batch = 1300
    state_big = jax.random.normal(k_big, (big_batch, NUM_STATES), jnp.float32)
    out_big = jax.block_until_ready(actor_forward(state_big, *params))
    assert out_big.shape == (big_batch, ACTION_DIM)
    assert jnp.allclose(out_big, reference(state_big), atol=2e-2, rtol=2e-2)

    print("KERNEL_OK")
</pallas_src>

<mosaic_0001>
module attributes {stable_mosaic.version = 11 : i64} {
  func.func @actor_kernel(%arg0: memref<8x3xf32, #tpu.memory_space<vmem>>, %arg1: memref<3x512xf32, #tpu.memory_space<vmem>>, %arg2: memref<1x512xf32, #tpu.memory_space<vmem>>, %arg3: memref<512x384xbf16, #tpu.memory_space<vmem>>, %arg4: memref<1x384xf32, #tpu.memory_space<vmem>>, %arg5: memref<1x384xf32, #tpu.memory_space<vmem>>, %arg6: memref<1x1xf32, #tpu.memory_space<vmem>>, %arg7: memref<8x1xf32, #tpu.memory_space<vmem>>) attributes {dimension_semantics = [], scalar_prefetch = 0 : i64, scratch_operands = 0 : i64, tpu.core_type = #tpu.core_type<tc>} {
    %c0 = arith.constant 0 : index
    %c0_0 = arith.constant 0 : index
    %0 = vector.load %arg0[%c0, %c0_0] : memref<8x3xf32, #tpu.memory_space<vmem>>, vector<8x3xf32>
    %c0_1 = arith.constant 0 : index
    %c0_2 = arith.constant 0 : index
    %1 = vector.load %arg2[%c0_1, %c0_2] : memref<1x512xf32, #tpu.memory_space<vmem>>, vector<1x512xf32>
    %2 = vector.extract_strided_slice %0 {offsets = [0, 0], sizes = [8, 1], strides = [1, 1]} : vector<8x3xf32> to vector<8x1xf32>
    %c0_3 = arith.constant 0 : index
    %c0_4 = arith.constant 0 : index
    %3 = vector.load %arg1[%c0_3, %c0_4] : memref<3x512xf32, #tpu.memory_space<vmem>>, vector<1x512xf32>
    %4 = vector.broadcast %2 : vector<8x1xf32> to vector<8x512xf32>
    %5 = vector.broadcast %3 : vector<1x512xf32> to vector<8x512xf32>
    %6 = arith.mulf %4, %5 : vector<8x512xf32>
    %7 = vector.broadcast %1 : vector<1x512xf32> to vector<8x512xf32>
    %8 = arith.addf %7, %6 : vector<8x512xf32>
    %9 = vector.extract_strided_slice %0 {offsets = [0, 1], sizes = [8, 1], strides = [1, 1]} : vector<8x3xf32> to vector<8x1xf32>
    %c1 = arith.constant 1 : index
    %c0_5 = arith.constant 0 : index
    %10 = vector.load %arg1[%c1, %c0_5] : memref<3x512xf32, #tpu.memory_space<vmem>>, vector<1x512xf32>
    %11 = vector.broadcast %9 : vector<8x1xf32> to vector<8x512xf32>
    %12 = vector.broadcast %10 : vector<1x512xf32> to vector<8x512xf32>
    %13 = arith.mulf %11, %12 : vector<8x512xf32>
    %14 = arith.addf %8, %13 : vector<8x512xf32>
    %15 = vector.extract_strided_slice %0 {offsets = [0, 2], sizes = [8, 1], strides = [1, 1]} : vector<8x3xf32> to vector<8x1xf32>
    %c2 = arith.constant 2 : index
    %c0_6 = arith.constant 0 : index
    %16 = vector.load %arg1[%c2, %c0_6] : memref<3x512xf32, #tpu.memory_space<vmem>>, vector<1x512xf32>
    %17 = vector.broadcast %15 : vector<8x1xf32> to vector<8x512xf32>
    %18 = vector.broadcast %16 : vector<1x512xf32> to vector<8x512xf32>
    %19 = arith.mulf %17, %18 : vector<8x512xf32>
    %20 = arith.addf %14, %19 : vector<8x512xf32>
    %cst = arith.constant 0.000000e+00 : f32
    %21 = vector.broadcast %cst : f32 to vector<8x512xf32>
    %22 = arith.maximumf %20, %21 : vector<8x512xf32>
    %23 = arith.truncf %22 : vector<8x512xf32> to vector<8x512xbf16>
    %c0_7 = arith.constant 0 : index
    %c0_8 = arith.constant 0 : index
    %24 = vector.load %arg3[%c0_7, %c0_8] : memref<512x384xbf16, #tpu.memory_space<vmem>>, vector<512x384xbf16>
    %cst_9 = arith.constant dense<0.000000e+00> : vector<8x384xf32>
    %25 = tpu.matmul %23, %24, %cst_9 {dimension_numbers = #tpu.dot_dimension_numbers<[1], [0], [0], [1], [0, 0, 1, 1], [], []>} : vector<8x512xbf16>, vector<512x384xbf16>, vector<8x384xf32> -> vector<8x384xf32>
    %c0_10 = arith.constant 0 : index
    %c0_11 = arith.constant 0 : index
    %26 = vector.load %arg4[%c0_10, %c0_11] : memref<1x384xf32, #tpu.memory_space<vmem>>, vector<1x384xf32>
    %27 = vector.broadcast %26 : vector<1x384xf32> to vector<8x384xf32>
    %28 = arith.addf %25, %27 : vector<8x384xf32>
    %cst_12 = arith.constant 0.000000e+00 : f32
    %29 = vector.broadcast %cst_12 : f32 to vector<8x384xf32>
    %30 = arith.maximumf %28, %29 : vector<8x384xf32>
    %c0_13 = arith.constant 0 : index
    %c0_14 = arith.constant 0 : index
    %31 = vector.load %arg5[%c0_13, %c0_14] : memref<1x384xf32, #tpu.memory_space<vmem>>, vector<1x384xf32>
    %32 = vector.broadcast %31 : vector<1x384xf32> to vector<8x384xf32>
    %33 = arith.mulf %30, %32 : vector<8x384xf32>
    %cst_15 = arith.constant dense<0.000000e+00> : vector<8xf32>
    %34 = vector.multi_reduction <add>, %33, %cst_15 [1] : vector<8x384xf32> to vector<8xf32>
    %35 = vector.shape_cast %34 : vector<8xf32> to vector<8x1xf32>
    %c0_16 = arith.constant 0 : index
    %c0_17 = arith.constant 0 : index
    %36 = vector.load %arg6[%c0_16, %c0_17] : memref<1x1xf32, #tpu.memory_space<vmem>>, vector<1x1xf32>
    %37 = vector.broadcast %36 : vector<1x1xf32> to vector<8x1xf32>
    %38 = arith.addf %35, %37 : vector<8x1xf32>
    %39 = math.tanh %38 : vector<8x1xf32>
    %cst_18 = arith.constant 2.000000e+00 : f32
    %40 = vector.broadcast %cst_18 : f32 to vector<8x1xf32>
    %41 = arith.mulf %39, %40 : vector<8x1xf32>
    %c0_19 = arith.constant 0 : index
    %c0_20 = arith.constant 0 : index
    %42 = vector.load %arg7[%c0_19, %c0_20] : memref<8x1xf32, #tpu.memory_space<vmem>>, vector<8x1xf32>
    tpu.vector_store %arg7[%c0_19, %c0_20], %41 {strides = array<i32>} : memref<8x1xf32, #tpu.memory_space<vmem>>, vector<8x1xf32>,
    return
  }
}

</mosaic_0001>

<bundles_post_ra>
// kernel: actor_forward.1
= control target key start
LH: loop header
LB: loop body
LE: loop exit
PB: predicated region body
PF: predicated region fallthrough
CT: control target
= control target key end

     0   :  { %s1506_s0 = inlined_call_operand.vmem [shape: f32[8,3], index: 0, kind: input, shape index: {}]   ;;  %s1507_s1 = inlined_call_operand.vmem [shape: f32[3,512], index: 1, kind: input, shape index: {}]   ;;  %s1508_s2 = inlined_call_operand.vmem [shape: f32[1,512], index: 2, kind: input, shape index: {}]   ;;  %s1509_s3 = inlined_call_operand.hbm [shape: bf16[512,384], index: 3, kind: input, shape index: {}]   ;;  %s1510_s4 = inlined_call_operand.vmem [shape: f32[1,384], index: 4, kind: input, shape index: {}]   ;;  %s1511_s5 = inlined_call_operand.vmem [shape: f32[1,384], index: 5, kind: input, shape index: {}]   ;;  %s1512_s6 = inlined_call_operand.<no memory space> [shape: f32[1,1], index: 6, kind: input, shape index: {}]   ;;  %s1513_s7 = inlined_call_operand.vmem [shape: f32[8,1], index: 7, kind: output, shape index: {}]  }
   0x1   :  { %v12_v0 = vstv %s1512_s6 }
   0x2   :  { %13 = vst [vmem:[#allocation2] sm:$0x1] %v12_v0 }
   0x3   :  { %14 = vsyncpa [#allocation4], 0  ;;  %s1355_s26 = smov [#allocation3]   ;;  %s1331_s30 = scalar_lea.hbm %s1509_s3, 12288 }
   0x4   :  { %s26_s27 = sshll.u32 %s1355_s26, 4  ;;  %p1332_p0 = scmp.ne.s32.totalorder %s1509_s3, %s1331_s30  ;;  %s27_s27 = int_to_ptr.vmem [resolvable:$true] %s26_s27 }
   0x5   :  { %p1335_p1 = scmp.lt.u32.totalorder %s1331_s30, %s1509_s3 }
   0x7   :  { %p1337_p2 = pnand %p1335_p1, %p1332_p0 }
   0x9   :  { %1340 = shalt.err (!%p1337_p2)
}
   0xa   :  { %s1341_s6 = scalar_lea.vmem %s27_s27, 12288  ;;  %p1346_p4 = scmp.lt.s32.totalorder %s27_s27, %s27_s27 }
   0xb   :  { %p1342_p3 = scmp.ne.s32.totalorder %s27_s27, %s1341_s6  ;;  %p1347_p5 = scmp.lt.s32.totalorder %s1341_s6, %s1341_s6 }
   0xd   :  { %p1348_p6 = por %p1347_p5, %p1346_p4 }
   0xf   :  { %p1349_p7 = pnand %p1348_p6, %p1342_p3 }
  0x11   :  { %1352 = shalt.err (!%p1349_p7)
}
  0x12   :  { %s1356_s12 = smov 192   ;;  %s1357_s13 = smov 12  }
  0x13   :  { %32 = dma.hbm_to_vmem [thread:$0]  %s1509_s3, 12288, %s27_s27, [#allocation4], %s1356_s12, %s1356_s12, %s1357_s13  }
  0x14   :  { %1353 = dma.done.wait [#allocation4], 12288  }
  0x15   :  { %1354 = vsyncadd [#allocation4], 4294955008  ;;  %v1358_v1 = vmov 0   ;;  %v1359_v2 = vmov 2   ;;  %v43_v3 = vld [vmem:[%s1506_s0] sm:$0xff]  ;;  %v1360_v8 = vmov 1   ;;  %v52_v55 = vlaneseq }
  0x16   :  { %1197 = vset.pattern.permute.xlu0 %v1358_v1  ;;  %1199 = vset.pattern.permute.xlu1 %v1359_v2  ;;  %v1201_v4 = vld [vmem:[#allocation3 + $0x4] ss:$12 sps:$4 sm:$0xff]   ;;  %v1203_v5 = vld [vmem:[#allocation3] ss:$12 sps:$4 sm:$0xff]   ;;  %v1204_v6 = vld [vmem:[#allocation3 + $0x1c] ss:$12 sps:$4 sm:$0xff]  }
  0x17   :  { %48 = vperm.xlu0 %1197, %v43_v3   ;;  %139 = vperm.xlu1 %1199, %v43_v3   ;;  %v1206_v7 = vld [vmem:[#allocation3 + $0x18] ss:$12 sps:$4 sm:$0xff]   ;;  %v1207_v9 = vld [vmem:[#allocation3 + $0x34] ss:$12 sps:$4 sm:$0xff]   ;;  %v1209_v10 = vld [vmem:[#allocation3 + $0x30] ss:$12 sps:$4 sm:$0xff]  }
  0x18   :  { %836 = vmatprep.subr.bf16.mxu0 %v1201_v4  ;;  %v1210_v11 = vld [vmem:[#allocation3 + $0x4c] ss:$12 sps:$4 sm:$0xff]   ;;  %v1212_v12 = vld [vmem:[#allocation3 + $0x48] ss:$12 sps:$4 sm:$0xff]   ;;  %v1213_v14 = vld [vmem:[#allocation3 + $0x64] ss:$12 sps:$4 sm:$0xff]  }
  0x19   :  { %837 = vmatpush1.bf16.msra.mxu0 %v1203_v5  ;;  %v1227_v13 = vld [vmem:[#allocation3 + $0xc8] ss:$12 sps:$4 sm:$0xff]   ;;  %v1215_v16 = vld [vmem:[#allocation3 + $0x60] ss:$12 sps:$4 sm:$0xff]   ;;  %v1218_v20 = vld [vmem:[#allocation3 + $0x78] ss:$12 sps:$4 sm:$0xff]  }
  0x1a   :  { %838 = vmatprep.subr.bf16.mxu0 %v1204_v6  ;;  %1141 = vmatprep.subr.bf16.mxu1 %v1227_v13  ;;  %v1229_v15 = vld [vmem:[#allocation3 + $0x8] ss:$12 sps:$4 sm:$0xff]   ;;  %v1232_v18 = vld [vmem:[#allocation3 + $0xe0] ss:$12 sps:$4 sm:$0xff]   ;;  %v1237_v21 = vld [vmem:[#allocation3 + $0xf8] ss:$12 sps:$4 sm:$0xff]  }
  0x1b   :  { %1198 = vset.pattern.permute.xlu0 %v1360_v8  ;;  %v1216_v17 = vld [vmem:[#allocation3 + $0x7c] ss:$12 sps:$4 sm:$0xff]   ;;  %1142 = vmatpush3.bf16.msra.mxu1 %v1229_v15  ;;  %v1234_v19 = vld [vmem:[#allocation3 + $0x20] ss:$12 sps:$4 sm:$0xff]   ;;  %v1239_v22 = vld [vmem:[#allocation3 + $0x38] ss:$12 sps:$4 sm:$0xff]  }
  0x1c   :  { %104 = vperm.xlu0 %1198, %v43_v3   ;;  %1143 = vmatprep.subr.bf16.mxu1 %v1232_v18  ;;  %v1219_v23 = vld [vmem:[#allocation3 + $0x94] ss:$12 sps:$4 sm:$0xff]   ;;  %v1242_v24 = vld [vmem:[#allocation3 + $0x110] ss:$12 sps:$4 sm:$0xff]   ;;  %v1222_v27 = vld [vmem:[#allocation3 + $0xac] ss:$12 sps:$4 sm:$0xff]  }
  0x1d   :  { %839 = vmatpush1.bf16.msra.mxu0 %v1206_v7  ;;  %v1221_v25 = vld [vmem:[#allocation3 + $0x90] ss:$12 sps:$4 sm:$0xff]   ;;  %v1247_v28 = vld [vmem:[#allocation3 + $0x128] ss:$12 sps:$4 sm:$0xff]   ;;  %v1252_v32 = vld [vmem:[#allocation3 + $0x140] ss:$12 sps:$4 sm:$0xff]  }
  0x1e   :  { %840 = vmatprep.subr.bf16.mxu0 %v1207_v9  ;;  %v1244_v26 = vld [vmem:[#allocation3 + $0x50] ss:$12 sps:$4 sm:$0xff]   ;;  %v1224_v29 = vld [vmem:[#allocation3 + $0xa8] ss:$12 sps:$4 sm:$0xff]   ;;  %v1228_v33 = vld [vmem:[#allocation3 + $0xc0] ss:$12 sps:$4 sm:$0xff]  }
  0x1f   :  { %1144 = vmatpush3.bf16.msra.mxu1 %v1234_v19  ;;  %v1225_v30 = vld [vmem:[#allocation3 + $0xc4] ss:$12 sps:$4 sm:$0xff]   ;;  %v1249_v31 = vld [vmem:[#allocation3 + $0x68] ss:$12 sps:$4 sm:$0xff]   ;;  %v1254_v34 = vld [vmem:[#allocation3 + $0x80] ss:$12 sps:$4 sm:$0xff]  }
  0x20   :  { %1200 = vset.pattern.permute.xlu0 %v1359_v2  ;;  %1145 = vmatprep.subr.bf16.mxu1 %v1237_v21  ;;  %v1230_v35 = vld [vmem:[#allocation3 + $0xdc] ss:$12 sps:$4 sm:$0xff]   ;;  %v1233_v36 = vld [vmem:[#allocation3 + $0xd8] ss:$12 sps:$4 sm:$0xff]   ;;  %v1235_v38 = vld [vmem:[#allocation3 + $0xf4] ss:$12 sps:$4 sm:$0xff]  }
  0x21   :  { %841 = vmatpush1.bf16.msra.mxu0 %v1209_v10  ;;  %v1257_v37 = vld [vmem:[#allocation3 + $0x158] ss:$12 sps:$4 sm:$0xff]   ;;  %v1262_v40 = vld [vmem:[#allocation3 + $0x170] ss:$12 sps:$4 sm:$0xff]   ;;  %v1268_v44 = vld [vmem:[#allocation3 + $0x248] ss:$12 sps:$4 sm:$0xff]  }
  0x22   :  { %842 = vmatprep.subr.bf16.mxu0 %v1210_v11  ;;  %v1259_v39 = vld [vmem:[#allocation3 + $0x98] ss:$12 sps:$4 sm:$0xff]   ;;  %v1238_v41 = vld [vmem:[#allocation3 + $0xf0] ss:$12 sps:$4 sm:$0xff]   ;;  %v1243_v45 = vld [vmem:[#allocation3 + $0x108] ss:$12 sps:$4 sm:$0xff]  }
  0x23   :  { %1146 = vmatpush3.bf16.msra.mxu1 %v1239_v22  ;;  %v1240_v42 = vld [vmem:[#allocation3 + $0x10c] ss:$12 sps:$4 sm:$0xff]   ;;  %v1264_v43 = vld [vmem:[#allocation3 + $0xb0] ss:$12 sps:$4 sm:$0xff]   ;;  %v1255_v50 = vld [vmem:[#allocation3 + $0x154] ss:$12 sps:$4 sm:$0xff]  }
  0x24   :  { %1147 = vmatprep.subr.bf16.mxu1 %v1242_v24  ;;  %v1245_v46 = vld [vmem:[#allocation3 + $0x124] ss:$12 sps:$4 sm:$0xff]   ;;  %v1248_v47 = vld [vmem:[#allocation3 + $0x120] ss:$12 sps:$4 sm:$0xff]   ;;  %v1250_v48 = vld [vmem:[#allocation3 + $0x13c] ss:$12 sps:$4 sm:$0xff]  }
  0x25   :  { %843 = vmatpush1.bf16.msra.mxu0 %v1212_v12  ;;  %v1253_v49 = vld [vmem:[#allocation3 + $0x138] ss:$12 sps:$4 sm:$0xff]   ;;  %v1258_v51 = vld [vmem:[#allocation3 + $0x150] ss:$12 sps:$4 sm:$0xff]   ;;  %v1263_v53 = vld [vmem:[#allocation3 + $0x168] ss:$12 sps:$4 sm:$0xff]  }
  0x26   :  { %844 = vmatprep.subr.bf16.mxu0 %v1213_v14  ;;  %v1260_v52 = vld [vmem:[#allocation3 + $0x16c] ss:$12 sps:$4 sm:$0xff]   ;;  %v1267_v54 = vld [vmem:[#allocation3 + $0x184] ss:$12 sps:$4 sm:$0xff]   ;;  %v1419_v56 = vshrl.u32 %v52_v55, 7  ;;  %vm1035_vm0 = vcmask 7168  }
  0x27   :  { %1148 = vmatpush3.bf16.msra.mxu1 %v1244_v26  ;;  %v1428_v59 = vld [vmem:[%s1507_s1] ss:$4 sm:$0xf]  ;;  %v1444_v0 = vld [vmem:[%s1507_s1 + $0x1] ss:$4 sm:$0xf] }
  0x28   :  { %1149 = vmatprep.subr.bf16.mxu1 %v1247_v28  ;;  %v1422_v57 = vsub.s32 0, %v1419_v56  ;;  %v66_v58 = vsub.s32 3, %v1419_v56  ;;  %v1431_v60 = vsub.s32 1, %v1419_v56  ;;  %v1436_v61 = vld [vmem:[%s1508_s2] sm:$0xf] }
  0x29   :  { %845 = vmatpush1.bf16.msra.mxu0 %v1215_v16  ;;  %v1449_v1 = vld [vmem:[%s1507_s1 + $0x2] ss:$4 sm:$0xf] }
  0x2a   :  { %846 = vmatprep.subr.bf16.mxu0 %v1216_v17  ;;  %v55_v62 = vrot.slane %v1428_v59, %v1422_v57  ;;  %v67_v63 = vrot.slane %v1428_v59, %v66_v58  ;;  %v59_v2 = vrot.slane %v1428_v59, %v1431_v60  ;;  %v80_v4 = vrot.slane %v1436_v61, %v1422_v57 }
  0x2b   :  { %1150 = vmatpush3.bf16.msra.mxu1 %v1249_v31  ;;  %v92_v5 = vrot.slane %v1436_v61, %v66_v58  ;;  %v111_v6 = vrot.slane %v1444_v0, %v1422_v57  ;;  %v146_v7 = vrot.slane %v1449_v1, %v1422_v57  ;;  %v158_v10 = vrot.slane %v1449_v1, %v66_v58 }
  0x2c   :  { %1151 = vmatprep.subr.bf16.mxu1 %v1252_v32  ;;  %v150_v12 = vrot.slane %v1449_v1, %v1431_v60  ;;  %v115_v14 = vrot.slane %v1444_v0, %v1431_v60  ;;  %v123_v15 = vrot.slane %v1444_v0, %v66_v58  ;;  %v84_v16 = vrot.slane %v1436_v61, %v1431_v60  ;;  %v1288_v58 = vld [vmem:[#allocation3 + $0x2a8] ss:$12 sps:$4 sm:$0xff]  }
  0x2d   :  { %847 = vmatpush1.bf16.msra.mxu0 %v1218_v20 }
  0x2e   :  { %848 = vmatprep.subr.bf16.mxu0 %v1219_v23 }
  0x2f   :  { %1152 = vmatpush3.bf16.msra.mxu1 %v1254_v34 }
  0x30   :  { %1153 = vmatprep.subr.bf16.mxu1 %v1257_v37  ;;  %v1265_v37 = vld [vmem:[#allocation3 + $0x180] ss:$12 sps:$4 sm:$0xff]  }
  0x31   :  { %849 = vmatpush1.bf16.msra.mxu0 %v1221_v25 }
  0x32   :  { %850 = vmatprep.subr.bf16.mxu0 %v1222_v27 }
  0x33   :  { %1154 = vmatpush3.bf16.msra.mxu1 %v1259_v39  ;;  %v1269_v39 = vld [vmem:[#allocation3 + $0x188] ss:$12 sps:$4 sm:$0xff]  }
  0x34   :  { %1155 = vmatprep.subr.bf16.mxu1 %v1262_v40  ;;  %v1272_v40 = vld [vmem:[#allocation3 + $0x19c] ss:$12 sps:$4 sm:$0xff]  }
  0x35   :  { %851 = vmatpush1.bf16.msra.mxu0 %v1224_v29 }
  0x36   :  { %852 = vmatprep.subr.bf16.mxu0 %v1225_v30 }
  0x37   :  { %1156 = vmatpush3.bf16.msra.mxu1 %v1264_v43  ;;  %v1270_v43 = vld [vmem:[#allocation3 + $0x198] ss:$12 sps:$4 sm:$0xff]  }
  0x38   :  { %1163 = vmatprep.subr.bf16.mxu1 %v1268_v44  ;;  %v1274_v44 = vld [vmem:[#allocation3 + $0x1a0] ss:$12 sps:$4 sm:$0xff]  }
  0x39   :  { %853 = vmatpush1.bf16.msra.mxu0 %v1228_v33 }
  0x3a   :  { %854 = vmatprep.subr.bf16.mxu0 %v1230_v35 }
  0x3d   :  { %855 = vmatpush1.bf16.msra.mxu0 %v1233_v36 }
  0x3e   :  { %856 = vmatprep.subr.bf16.mxu0 %v1235_v38 }
  0x41   :  { %857 = vmatpush1.bf16.msra.mxu0 %v1238_v41  ;;  %v1273_v41 = vld [vmem:[#allocation3 + $0x260] ss:$12 sps:$4 sm:$0xff]  }
  0x42   :  { %858 = vmatprep.subr.bf16.mxu0 %v1240_v42 }
  0x45   :  { %859 = vmatpush1.bf16.msra.mxu0 %v1243_v45  ;;  %v1277_v45 = vld [vmem:[#allocation3 + $0x1b4] ss:$12 sps:$4 sm:$0xff]  }
  0x46   :  { %860 = vmatprep.subr.bf16.mxu0 %v1245_v46  ;;  %v1278_v46 = vld [vmem:[#allocation3 + $0x278] ss:$12 sps:$4 sm:$0xff]  }
  0x49   :  { %861 = vmatpush1.bf16.msra.mxu0 %v1248_v47  ;;  %v1479_v47 = vsub.s32 2, %v1419_v56  ;;  %v1287_v56 = vld [vmem:[#allocation3 + $0x1e4] ss:$12 sps:$4 sm:$0xff]  }
  0x4a   :  { %862 = vmatprep.subr.bf16.mxu0 %v1250_v48  ;;  %v1275_v48 = vld [vmem:[#allocation3 + $0x1b0] ss:$12 sps:$4 sm:$0xff]  }
  0x4b   :  { %v119_v55 = vrot.slane %v1444_v0, %v1479_v47  ;;  %v1292_v0 = vld [vmem:[#allocation3 + $0x1fc] ss:$12 sps:$4 sm:$0xff]  }
  0x4d   :  { %863 = vmatpush1.bf16.msra.mxu0 %v1253_v49  ;;  %v1279_v49 = vld [vmem:[#allocation3 + $0x1b8] ss:$12 sps:$4 sm:$0xff]  }
  0x4e   :  { %864 = vmatprep.subr.bf16.mxu0 %v1255_v50  ;;  %v1282_v50 = vld [vmem:[#allocation3 + $0x1cc] ss:$12 sps:$4 sm:$0xff]  }
  0x51   :  { %865 = vmatpush1.bf16.msra.mxu0 %v1258_v51  ;;  %v1283_v51 = vld [vmem:[#allocation3 + $0x290] ss:$12 sps:$4 sm:$0xff]  }
  0x52   :  { %866 = vmatprep.subr.bf16.mxu0 %v1260_v52  ;;  %v63_v52 = vrot.slane %v1428_v59, %v1479_v47  ;;  %v1289_v59 = vld [vmem:[#allocation3 + $0x1e8] ss:$12 sps:$4 sm:$0xff]  }
  0x55   :  { %867 = vmatpush1.bf16.msra.mxu0 %v1263_v53  ;;  %v1280_v53 = vld [vmem:[#allocation3 + $0x1c8] ss:$12 sps:$4 sm:$0xff]  }
  0x56   :  { %877 = vmatprep.subr.bf16.mxu0 %v1267_v54  ;;  %v1284_v54 = vld [vmem:[#allocation3 + $0x1d0] ss:$12 sps:$4 sm:$0xff]  }
  0x96   :  { %v1453_v3 = vpop.permute.xlu0 %48  ;;  %v1465_v11 = vpop.permute.xlu1 %139 }
  0x97   :  { %v72_v8 = vmul.f32 %v55_v62, %v1453_v3  ;;  %v75_v9 = vmul.f32 %v67_v63, %v1453_v3  ;;  %v73_v13 = vmul.f32 %v59_v2, %v1453_v3  ;;  %v163_v17 = vmul.f32 %v146_v7, %v1465_v11  ;;  %v1285_v2 = vld [vmem:[#allocation3 + $0x1e0] ss:$12 sps:$4 sm:$0xff]  }
  0x98   :  { %v166_v21 = vmul.f32 %v158_v10, %v1465_v11  ;;  %v164_v22 = vmul.f32 %v150_v12, %v1465_v11  ;;  %v74_v62 = vmul.f32 %v63_v52, %v1453_v3  ;;  %v88_v63 = vrot.slane %v1436_v61, %v1479_v47  ;;  %v1294_v3 = vld [vmem:[#allocation3 + $0x200] ss:$12 sps:$4 sm:$0xff]   ;;  %v1298_v12 = vld [vmem:[#allocation3 + $0x2d8] ss:$12 sps:$4 sm:$0xff]  }
  0x99   :  { %v97_v18 = vadd.f32 %v80_v4, %v72_v8  ;;  %v100_v19 = vadd.f32 %v92_v5, %v75_v9  ;;  %v98_v26 = vadd.f32 %v84_v16, %v73_v13  ;;  %v154_v5 = vrot.slane %v1449_v1, %v1479_v47  ;;  %v1290_v8 = vld [vmem:[#allocation3 + $0x1f8] ss:$12 sps:$4 sm:$0xff]   ;;  %v1297_v10 = vld [vmem:[#allocation3 + $0x214] ss:$12 sps:$4 sm:$0xff]   ;;  %v1295_v13 = vld [vmem:[#allocation3 + $0x210] ss:$12 sps:$4 sm:$0xff]  }
  0x9a   :  { %v99_v7 = vadd.f32 %v88_v63, %v74_v62  ;;  %v1299_v1 = vld [vmem:[#allocation3 + $0x218] ss:$12 sps:$4 sm:$0xff]   ;;  %v1303_v16 = vld [vmem:[#allocation3 + $0x2f0] ss:$12 sps:$4 sm:$0xff]  }
  0x9b   :  { %v105_v20 = vpop.permute.xlu0 %104  ;;  %v165_v61 = vmul.f32 %v154_v5, %v1465_v11  ;;  %v1307_v11 = vld [vmem:[#allocation3 + $0x244] ss:$12 sps:$4 sm:$0xff]  }
  0x9c   :  { %v128_v23 = vmul.f32 %v111_v6, %v105_v20  ;;  %v129_v24 = vmul.f32 %v115_v14, %v105_v20  ;;  %v131_v25 = vmul.f32 %v123_v15, %v105_v20  ;;  %v130_v4 = vmul.f32 %v119_v55, %v105_v20  ;;  %v1293_v6 = vld [vmem:[#allocation3 + $0x2c0] ss:$12 sps:$4 sm:$0xff]  }
  0x9d   :  { %v1302_v15 = vld [vmem:[#allocation3 + $0x22c] ss:$12 sps:$4 sm:$0xff]  }
  0x9e   :  { %v132_v27 = vadd.f32 %v128_v23, %v97_v18  ;;  %v135_v28 = vadd.f32 %v131_v25, %v100_v19  ;;  %v133_v29 = vadd.f32 %v129_v24, %v98_v26  ;;  %v134_v9 = vadd.f32 %v130_v4, %v99_v7  ;;  %v1304_v18 = vld [vmem:[#allocation3 + $0x230] ss:$12 sps:$4 sm:$0xff]   ;;  %v1305_v20 = vld [vmem:[#allocation3 + $0x240] ss:$12 sps:$4 sm:$0xff]   ;;  %v1308_v23 = vld [vmem:[#allocation3 + $0x258] ss:$12 sps:$4 sm:$0xff]  }
  0x9f   :  { %v1313_v24 = vld [vmem:[#allocation3 + $0x274] ss:$12 sps:$4 sm:$0xff]   ;;  %v1311_v25 = vld [vmem:[#allocation3 + $0x270] ss:$12 sps:$4 sm:$0xff]   ;;  %v1316_v26 = vld [vmem:[#allocation3 + $0x28c] ss:$12 sps:$4 sm:$0xff]  }
  0xa0   :  { %v168_v30 = vadd.f32 %v164_v22, %v133_v29  ;;  %v167_v31 = vadd.f32 %v163_v17, %v132_v27  ;;  %v170_v32 = vadd.f32 %v166_v21, %v135_v28  ;;  %v169_v14 = vadd.f32 %v165_v61, %v134_v9  ;;  %v1300_v17 = vld [vmem:[#allocation3 + $0x228] ss:$12 sps:$4 sm:$0xff]   ;;  %v1319_v28 = vld [vmem:[#allocation3 + $0x2a4] ss:$12 sps:$4 sm:$0xff]   ;;  %v1317_v29 = vld [vmem:[#allocation3 + $0x2a0] ss:$12 sps:$4 sm:$0xff]  }
  0xa1   :  { %v1310_v22 = vld [vmem:[#allocation3 + $0x25c] ss:$12 sps:$4 sm:$0xff]  }
  0xa2   :  { %v172_v33 = vmax.f32 %v168_v30, 0.0  ;;  %v171_v34 = vmax.f32 %v167_v31, 0.0  ;;  %v174_v35 = vmax.f32 %v170_v32, 0.0  ;;  %v173_v19 = vmax.f32 %v169_v14, 0.0  ;;  %v1314_v27 = vld [vmem:[#allocation3 + $0x288] ss:$12 sps:$4 sm:$0xff]  }
  0xa3   :  { %v1322_v30 = vld [vmem:[#allocation3 + $0x2bc] ss:$12 sps:$4 sm:$0xff]   ;;  %v1320_v31 = vld [vmem:[#allocation3 + $0x2b8] ss:$12 sps:$4 sm:$0xff]   ;;  %v1325_v32 = vld [vmem:[#allocation3 + $0x2d4] ss:$12 sps:$4 sm:$0xff]  }
  0xa4   :  { %v176_v36 = vpack.c.bf16 %v172_v33, %v172_v33  ;;  %v175_v38 = vpack.c.bf16 %v171_v34, %v171_v34  ;;  %v178_v42 = vpack.c.bf16 %v174_v35, %v174_v35  ;;  %v177_v21 = vpack.c.bf16 %v173_v19, %v173_v19  ;;  %v1323_v33 = vld [vmem:[#allocation3 + $0x2d0] ss:$12 sps:$4 sm:$0xff]   ;;  %v1328_v34 = vld [vmem:[#allocation3 + $0x2ec] ss:$12 sps:$4 sm:$0xff]   ;;  %v1326_v35 = vld [vmem:[#allocation3 + $0x2e8] ss:$12 sps:$4 sm:$0xff]  }
  0xa6   :  { %868 = vmatprep.mubr.bf16.mxu0 %v176_v36  ;;  %950 = vmatprep.mubr.bf16.mxu1 %v176_v36 }
  0xa7   :  { %869 = vmatmul.mubr.bf16.vlgmr.msra.gmra.mrb[0].mxu0 %v175_v38  ;;  %951 = vmatmul.mubr.bf16.vlgmr.msra.gmra.mrb[0].mxu1 %v175_v38 }
  0xa8   :  { %878 = vmatpush1.bf16.msra.mxu0 %v1265_v37  ;;  %1164 = vmatpush3.bf16.msra.mxu1 %v1269_v39 }
  0xa9   :  { %909 = vmatprep.mubr.bf16.mxu0 %v178_v42  ;;  %990 = vmatprep.mubr.bf16.mxu1 %v178_v42 }
  0xaa   :  { %879 = vmatprep.subr.bf16.mxu0 %v1272_v40  ;;  %1165 = vmatprep.subr.bf16.mxu1 %v1273_v41  ;;  %v307_v41 = vld [vmem:[%s1510_s4] sm:$0x7] }
  0xab   :  { %v320_v42 = vrot.slane %v307_v41, %v1479_v47  ;;  %v316_v52 = vrot.slane %v307_v41, %v1431_v60 }
  0xac   :  { %880 = vmatpush1.bf16.msra.mxu0 %v1270_v43  ;;  %1166 = vmatpush3.bf16.msra.mxu1 %v1274_v44 }
  0xad   :  { %881 = vmatprep.subr.bf16.mxu0 %v1277_v45  ;;  %1167 = vmatprep.subr.bf16.mxu1 %v1278_v46 }
  0xb0   :  { %882 = vmatpush1.bf16.msra.mxu0 %v1275_v48  ;;  %1168 = vmatpush3.bf16.msra.mxu1 %v1279_v49 }
  0xb1   :  { %883 = vmatprep.subr.bf16.mxu0 %v1282_v50  ;;  %1169 = vmatprep.subr.bf16.mxu1 %v1283_v51  ;;  %v312_v51 = vrot.slane %v307_v41, %v1422_v57 }
  0xb4   :  { %884 = vmatpush1.bf16.msra.mxu0 %v1280_v53  ;;  %1170 = vmatpush3.bf16.msra.mxu1 %v1284_v54  ;;  %v1001_v54 = vld [vmem:[%s1511_s5] sm:$0x7] }
  0xb5   :  { %885 = vmatprep.subr.bf16.mxu0 %v1287_v56  ;;  %1171 = vmatprep.subr.bf16.mxu1 %v1288_v58  ;;  %v1006_v56 = vrot.slane %v1001_v54, %v1422_v57  ;;  %v1010_v63 = vrot.slane %v1001_v54, %v1431_v60 }
  0xb8   :  { %886 = vmatpush1.bf16.msra.mxu0 %v1285_v2  ;;  %1172 = vmatpush3.bf16.msra.mxu1 %v1289_v59 }
  0xb9   :  { %887 = vmatprep.subr.bf16.mxu0 %v1292_v0  ;;  %1173 = vmatprep.subr.bf16.mxu1 %v1293_v6  ;;  %v1014_v6 = vrot.slane %v1001_v54, %v1479_v47 }
  0xbc   :  { %888 = vmatpush1.bf16.msra.mxu0 %v1290_v8  ;;  %1174 = vmatpush3.bf16.msra.mxu1 %v1294_v3 }
  0xbd   :  { %889 = vmatprep.subr.bf16.mxu0 %v1297_v10  ;;  %1175 = vmatprep.subr.bf16.mxu1 %v1298_v12  ;;  %v1140_v10 = vld [vmem:[#allocation2] ss:$0 sm:$0xff] }
  0xc0   :  { %890 = vmatpush1.bf16.msra.mxu0 %v1295_v13  ;;  %1176 = vmatpush3.bf16.msra.mxu1 %v1299_v1 }
  0xc1   :  { %891 = vmatprep.subr.bf16.mxu0 %v1302_v15  ;;  %1177 = vmatprep.subr.bf16.mxu1 %v1303_v16 }
  0xc4   :  { %892 = vmatpush1.bf16.msra.mxu0 %v1300_v17  ;;  %1178 = vmatpush3.bf16.msra.mxu1 %v1304_v18 }
  0xc5   :  { %893 = vmatprep.subr.bf16.mxu0 %v1307_v11 }
  0xc7   :  { %991 = vmatmul.mubr.bf16.vlgmr.msra.gmra.mrb[4].mxu1 %v177_v21 }
  0xc8   :  { %894 = vmatpush1.bf16.msra.mxu0 %v1305_v20 }
  0xc9   :  { %895 = vmatprep.subr.bf16.mxu0 %v1310_v22 }
  0xcc   :  { %896 = vmatpush1.bf16.msra.mxu0 %v1308_v23 }
  0xcd   :  { %897 = vmatprep.subr.bf16.mxu0 %v1313_v24 }
  0xd0   :  { %898 = vmatpush1.bf16.msra.mxu0 %v1311_v25 }
  0xd1   :  { %899 = vmatprep.subr.bf16.mxu0 %v1316_v26 }
  0xd4   :  { %900 = vmatpush1.bf16.msra.mxu0 %v1314_v27 }
  0xd5   :  { %901 = vmatprep.subr.bf16.mxu0 %v1319_v28 }
  0xd8   :  { %902 = vmatpush1.bf16.msra.mxu0 %v1317_v29 }
  0xd9   :  { %903 = vmatprep.subr.bf16.mxu0 %v1322_v30 }
  0xdc   :  { %904 = vmatpush1.bf16.msra.mxu0 %v1320_v31 }
  0xdd   :  { %905 = vmatprep.subr.bf16.mxu0 %v1325_v32 }
  0xe0   :  { %906 = vmatpush1.bf16.msra.mxu0 %v1323_v33 }
  0xe1   :  { %907 = vmatprep.subr.bf16.mxu0 %v1328_v34 }
  0xe4   :  { %908 = vmatpush1.bf16.msra.mxu0 %v1326_v35 }
  0xe7   :  { %910 = vmatmul.mubr.bf16.vlgmr.msra.gmra.mrb[0].mxu0 %v177_v21 }
 0x17a   :  { %v1157_v36 = vpop.f32.mrb[0].mxu1 }
 0x17b   :  { %v1158_v37 = vpop.f32.mrb[1].mxu1 }
 0x17c   :  { %v1159_v38 = vadd.f32 %v1158_v37, %v1157_v36  ;;  %v1160_v39 = vpop.f32.mrb[2].mxu1 }
 0x17d   :  { %v1161_v40 = vpop.f32.mrb[3].mxu1 }
 0x17e   :  { %v953_v45 = vadd.f32 %v1159_v38, %v320_v42 }
 0x19a   :  { %v1179_v43 = vpop.f32.mrb[4].mxu1 }
 0x19b   :  { %v1180_v44 = vpop.f32.mrb[5].mxu1 }
 0x19c   :  { %v1181_v46 = vadd.f32 %v1180_v44, %v1179_v43  ;;  %v1182_v48 = vpop.f32.mrb[6].mxu1 }
 0x19d   :  { %v1183_v49 = vpop.f32.mrb[7].mxu1 }
 0x19e   :  { %v993_v50 = vadd.f32 %v1181_v46, %v953_v45 }
 0x1a0   :  { %v1000_v5 = vmax.f32 %v993_v50, 0.0 }
 0x1a2   :  { %v1020_v3 = vmul.f32 %v1014_v6, %v1000_v5 }
 0x1ba   :  { %v911_v53 = vpop.f32.mrb[0].mxu0 }
 0x1bb   :  { %v1185_v55 = vadd.f32 %v911_v53, %v312_v51  ;;  %v913_v58 = vpop.f32.mrb[1].mxu0 }
 0x1bc   :  { %v1186_v62 = vadd.f32 %v913_v58, %v316_v52  ;;  %v915_v2 = vpop.f32.mrb[2].mxu0 }
 0x1bd   :  { %v998_v59 = vmax.f32 %v1185_v55, 0.0  ;;  %v916_v4 = vpop.f32.mrb[3].mxu0 }
 0x1be   :  { %v999_v0 = vmax.f32 %v1186_v62, 0.0 }
 0x1bf   :  { %v1018_v7 = vmul.f32 %v1006_v56, %v998_v59 }
 0x1c0   :  { %v1019_v8 = vmul.f32 %v1010_v63, %v999_v0 }
 0x1c2   :  { %v1021_v9 = vadd.f32 %v1019_v8, %v1018_v7 }
 0x1c4   :  { %v1022_v61 = vadd.f32 %v1021_v9, %v1020_v3 }
 0x1c6   :  { %1023 = vadd.xlane.f32.xlu1 %v1022_v61 }
 0x253   :  { %v1024_v12 = vpop.xlane.xlu1 %1023 }
 0x254   :  { %v1032_v57 = vadd.f32 %v1140_v10, %v1024_v12 }
 0x256   :  { %1329 = vtanh.f32 %v1032_v57 }
 0x260   :  { %v1330_v13 = vpop.eup %1329 }
 0x261   :  { %v1034_v60 = vmul.f32 2.0, %v1330_v13 }
 0x263   :  { %1036 = vst.msk [vmem:[%s1513_s7] sm:$0xff] %vm1035_vm0, %v1034_v60 }
 0x264   :  { %1041 = vsyncpa [#allocation4], 1 }

</bundles_post_ra>
